<compile_context>
chip_gen: v7x
topology: tpu7x:2x2x1
jax: 0.10.0
libtpu: 0.0.40
codegen_flags: <defaults>
</compile_context>

<pallas_src>
import functools
import math

import jax
import jax.numpy as jnp
from jax.experimental import pallas as pl
from jax.experimental.pallas import tpu as pltpu

_LANE = 128
_MASK_FILL = -1e12     # matches the module's mask_coef


def _round_up(x, m):
    return (x + m - 1) // m * m


def _cdiv(a, b):
    return (a + b - 1) // b


def _pad2d(a, rows, cols):
    return jnp.pad(a, ((0, rows - a.shape[0]), (0, cols - a.shape[1])))


@functools.lru_cache(maxsize=None)
def _vmem_capacity_bytes():
    try:
        cap = int(getattr(pltpu.get_tpu_info(), "vmem_capacity_bytes", 0) or 0)
        if cap > 0:
            return cap
    except Exception:
        pass
    return 64 * 1024 * 1024   # conservative default (v7x per-TC VMEM)


def _default_tile_m():
    # 128-MiB VMEM parts (v5e/v6e) can afford bigger row tiles; v7x (64 MiB) stays at 256.
    return 512 if _vmem_capacity_bytes() >= 96 * 1024 * 1024 else 256


def _choose_tile_m(n_rows, tile_m):
    if tile_m is None:
        tile_m = _default_tile_m()
    n8 = _round_up(n_rows, 8)
    tm = min(tile_m, n8)
    # v7x has 2 TensorCores: make sure the 1-D "parallel" grid has >= 2 steps.
    if n8 > 8 and _cdiv(n8, tm) < 2:
        tm = max(8, _round_up(_cdiv(n8, 2), 8))
    return tm


def _compiler_params(est_bytes, semantics):
    cap = _vmem_capacity_bytes()
    ceiling = (cap * 7) // 8                     # leave headroom for compiler scratch
    limit = int(min(ceiling, max(int(1.5 * est_bytes), 32 * 1024 * 1024)))
    return pltpu.CompilerParams(dimension_semantics=semantics,
                                vmem_limit_bytes=limit)


# ---------------------------------------------------------------------------
# in-kernel helper
# ---------------------------------------------------------------------------

def _ln_rows(x, gamma, beta, true_dim, eps):
    """LayerNorm over the last axis of a (rows, Dpad) tile, all statistics in f32.

    Padded columns (>= true_dim) of x are zero; the centered second moment is corrected for
    the (Dpad - true_dim) padded columns (each contributes mean^2), so the result matches an
    unpadded nn.LayerNorm exactly. gamma/beta are zero in the padding, keeping the output
    zero-padded.
    """
    xf = x.astype(jnp.float32)
    padded_dim = x.shape[-1]
    inv_d = 1.0 / float(true_dim)
    mean = jnp.sum(xf, axis=-1, keepdims=True) * inv_d
    centered = xf - mean
    ss = jnp.sum(centered * centered, axis=-1, keepdims=True)
    ss = ss - float(padded_dim - true_dim) * mean * mean
    var = ss * inv_d                          # biased variance (matches nn.LayerNorm)
    inv = jax.lax.rsqrt(var + eps)            # EUP rsqrt
    return centered * inv * gamma.astype(jnp.float32) + beta.astype(jnp.float32)


# ---------------------------------------------------------------------------
# kernels
# ---------------------------------------------------------------------------

def _ln_linear_kernel(x_ref, g_ref, be_ref, w_ref, b_ref, o_ref, *, true_dim, eps):
    """o = LayerNorm(x) @ W + b   (fused pre-norm QKV projection, bf16 MXU, f32 acc)."""
    xn = _ln_rows(x_ref[...], g_ref[...], be_ref[...], true_dim, eps)
    xn = xn.astype(w_ref.dtype)                       # bf16 operands to the MXU
    y = jnp.dot(xn, w_ref[...], preferred_element_type=jnp.float32)
    o_ref[...] = (y + b_ref[...]).astype(o_ref.dtype)


def _linear_residual_kernel(a_ref, res_ref, w_ref, b_ref, o_ref):
    """o = res + a @ W + b   (attention output projection + residual add in f32)."""
    a = a_ref[...].astype(w_ref.dtype)
    y = jnp.dot(a, w_ref[...], preferred_element_type=jnp.float32)
    y = y + b_ref[...]
    o_ref[...] = (res_ref[...].astype(jnp.float32) + y).astype(o_ref.dtype)


def _ln_ffn_residual_kernel(x_ref, g_ref, be_ref, w1_ref, b1_ref, w2_ref, b2_ref,
                            o_ref, *, true_dim, eps):
    """o = x + W2 @ GELU(W1 @ LayerNorm(x) + b1) + b2   (fused pre-norm FFN sublayer)."""
    x = x_ref[...]
    xn = _ln_rows(x, g_ref[...], be_ref[...], true_dim, eps).astype(w1_ref.dtype)
    h = jnp.dot(xn, w1_ref[...], preferred_element_type=jnp.float32)
    h = jax.nn.gelu(h + b1_ref[...], approximate=False)   # nn.GELU default (erf)
    h = h.astype(w2_ref.dtype)                             # full-rate bf16 MXU on 2nd matmul
    y = jnp.dot(h, w2_ref[...], preferred_element_type=jnp.float32)
    y = y + b2_ref[...]
    o_ref[...] = (x.astype(jnp.float32) + y).astype(o_ref.dtype)


def _layernorm_kernel(x_ref, g_ref, be_ref, o_ref, *, true_dim, eps):
    o_ref[...] = _ln_rows(x_ref[...], g_ref[...], be_ref[...],
                          true_dim, eps).astype(o_ref.dtype)


def _attention_core_kernel(q_ref, k_ref, v_ref, mask_ref, o_ref, *, mask_fill):
    """One (batch, head): o = softmax(masked_fill(q k^T, mask==0, -1e12)) v.

    1/sqrt(ah) is pre-folded into the Q weights/bias, so no score scaling is needed here.
    """
    s = jax.lax.dot_general(q_ref[...], k_ref[...],
                            dimension_numbers=(((1,), (1,)), ((), ())),
                            preferred_element_type=jnp.float32)       # (S, S) scores
    m = mask_ref[0]                                                   # (S, S) int mask
    s = jnp.where(m == 0, jnp.float32(mask_fill), s)
    s = s - jnp.max(s, axis=-1, keepdims=True)
    p = jnp.exp(s)
    p = p * pl.reciprocal(jnp.sum(p, axis=-1, keepdims=True), approx=True)
    o = jnp.dot(p.astype(v_ref.dtype), v_ref[...], preferred_element_type=jnp.float32)
    o_ref[...] = o.astype(o_ref.dtype)


# ---------------------------------------------------------------------------
# pallas_call wrappers
# ---------------------------------------------------------------------------

def _row_tiled_call(kernel, row_inputs, const_inputs, out_cols, out_dtype, *,
                    tile_m=None, cost_estimate=None, extra_vmem_per_row=0):
    """Run `kernel` over row tiles of the (rows, cols_i) `row_inputs`.

    Rows are zero-padded to a multiple of the tile (cdiv grid — no divisibility assert);
    `const_inputs` (weights / biases / LN params) are grid-invariant and VMEM-resident.
    """
    n = row_inputs[0].shape[0]
    tm = _choose_tile_m(n, tile_m)
    npad = _round_up(n, tm)
    if npad != n:
        row_inputs = [jnp.pad(a, ((0, npad - n), (0, 0))) for a in row_inputs]
    grid = (npad // tm,)

    in_specs = [pl.BlockSpec((tm, a.shape[1]), lambda i: (i, 0)) for a in row_inputs]
    in_specs += [pl.BlockSpec(a.shape, lambda i: (0, 0)) for a in const_inputs]

    # VMEM estimate: double-buffered row blocks + output + resident consts + in-kernel
    # f32 temporaries (LN / GELU intermediates) per row.
    est = 2 * tm * out_cols * jnp.dtype(out_dtype).itemsize
    for a in row_inputs:
        est += 2 * tm * a.shape[1] * a.dtype.itemsize
    for a in const_inputs:
        est += 2 * a.size * a.dtype.itemsize
    est += tm * int(extra_vmem_per_row)

    out = pl.pallas_call(
        kernel,
        out_shape=jax.ShapeDtypeStruct((npad, out_cols), out_dtype),
        grid_spec=pltpu.PrefetchScalarGridSpec(
            num_scalar_prefetch=0,
            grid=grid,
            in_specs=in_specs,
            out_specs=pl.BlockSpec((tm, out_cols), lambda i: (i, 0)),
        ),
        compiler_params=_compiler_params(est, ("parallel",)),
        cost_estimate=cost_estimate,
    )(*row_inputs, *const_inputs)
    return out[:n] if npad != n else out


def _attention_core(qkv, mask, *, batch, seq, head_count, ahpad, out_dtype):
    """qkv: (B*S, 3*H*ahpad) bf16 slab; mask: (B, S, S) int; returns (B*S, H*ahpad).

    Grid (B, H); q/k/v blocks are rectangular BlockSpec slices of the qkv slab, the output
    is written straight into the per-head-padded layout the projection kernel consumes.
    """
    h = head_count
    est = (2 * 4 * seq * ahpad * jnp.dtype(out_dtype).itemsize   # q, k, v, out (x2 buffers)
           + 2 * seq * seq * mask.dtype.itemsize                 # mask block
           + 2 * seq * seq * 4)                                  # f32 scores + probs
    kernel = functools.partial(_attention_core_kernel, mask_fill=_MASK_FILL)
    return pl.pallas_call(
        kernel,
        out_shape=jax.ShapeDtypeStruct((batch * seq, h * ahpad), out_dtype),
        grid_spec=pltpu.PrefetchScalarGridSpec(
            num_scalar_prefetch=0,
            grid=(batch, h),
            in_specs=[
                pl.BlockSpec((seq, ahpad), lambda b_, h_: (b_, h_)),            # q slab
                pl.BlockSpec((seq, ahpad), lambda b_, h_: (b_, h + h_)),        # k slab
                pl.BlockSpec((seq, ahpad), lambda b_, h_: (b_, 2 * h + h_)),    # v slab
                pl.BlockSpec((1, seq, seq), lambda b_, h_: (b_, 0, 0)),         # int mask
            ],
            out_specs=pl.BlockSpec((seq, ahpad), lambda b_, h_: (b_, h_)),
        ),
        compiler_params=_compiler_params(est, ("parallel", "parallel")),
    )(qkv, qkv, qkv, mask)


# ---------------------------------------------------------------------------
# parameters
# ---------------------------------------------------------------------------

def init_encoder_params(key, *, num_blocks, dim, head_count, attn_coef, ffn_coef):
    ah = int(dim * attn_coef)      # per-head abstract dim (MultiHeadAttentionBlock)
    hid = int(dim * ffn_coef)      # FFN hidden dim (FeedForwardBlock)

    def linear(k, fan_in, fan_out):
        kw, kb = jax.random.split(k)
        lim = 1.0 / math.sqrt(fan_in)
        w = jax.random.uniform(kw, (fan_in, fan_out), jnp.float32, -lim, lim)
        b = jax.random.uniform(kb, (fan_out,), jnp.float32, -lim, lim)
        return w, b

    blocks = []
    for _ in range(num_blocks):
        key, kq, kk, kv, kp, k1, k2 = jax.random.split(key, 7)
        wq, bq = linear(kq, dim, head_count * ah)
        wk, bk = linear(kk, dim, head_count * ah)
        wv, bv = linear(kv, dim, head_count * ah)
        wp, bp = linear(kp, head_count * ah, dim)
        w1, b1 = linear(k1, dim, hid)
        w2, b2 = linear(k2, hid, dim)
        blocks.append(dict(
            g1=jnp.ones((dim,), jnp.float32), be1=jnp.zeros((dim,), jnp.float32),
            wq=wq, bq=bq, wk=wk, bk=bk, wv=wv, bv=bv, wp=wp, bp=bp,
            g2=jnp.ones((dim,), jnp.float32), be2=jnp.zeros((dim,), jnp.float32),
            w1=w1, b1=b1, w2=w2, b2=b2))
    return dict(blocks=blocks,
                gf=jnp.ones((dim,), jnp.float32), bef=jnp.zeros((dim,), jnp.float32),
                dim=dim, head_count=head_count, ah=ah, hid=hid)


def pad_encoder_params(params, *, param_dtype=jnp.bfloat16):
    """Pad / re-lay-out parameters once (reused every step).

    Weights -> bf16, lane-padded to multiples of 128.  Q/K/V weights are laid out with
    per-head 128-wide column slabs (so the attention core gets lane-dense blocks straight
    from the QKV slab); the projection weight uses matching per-head row slabs.
    1/sqrt(ah) is folded into the Q weights/bias.  Biases and LN params stay f32.
    """
    dim, ah, hid, h = params["dim"], params["ah"], params["hid"], params["head_count"]
    dpad = _round_up(dim, _LANE)
    ahpad = _round_up(ah, _LANE)
    hidpad = _round_up(hid, _LANE)
    q_scale = 1.0 / math.sqrt(ah)

    def pw(w, r, c):
        return _pad2d(w, r, c).astype(param_dtype)

    def pb(b, c):
        return _pad2d(b.reshape(1, -1), 1, c).astype(jnp.float32)

    def per_head_cols(w, b, scl=1.0):
        # (dim, h*ah) -> (dpad, h*ahpad): head slab j occupies columns [j*ahpad, j*ahpad+ah)
        w3 = (w * scl).reshape(dim, h, ah)
        w3 = jnp.pad(w3, ((0, dpad - dim), (0, 0), (0, ahpad - ah)))
        b2 = (b * scl).reshape(h, ah)
        b2 = jnp.pad(b2, ((0, 0), (0, ahpad - ah)))
        return w3.reshape(dpad, h * ahpad).astype(param_dtype), \
               b2.reshape(1, h * ahpad).astype(jnp.float32)

    def per_head_rows(w):
        # (h*ah, dim) -> (h*ahpad, dpad): head slab j occupies rows [j*ahpad, j*ahpad+ah)
        w3 = w.reshape(h, ah, dim)
        w3 = jnp.pad(w3, ((0, 0), (0, ahpad - ah), (0, dpad - dim)))
        return w3.reshape(h * ahpad, dpad).astype(param_dtype)

    pblocks = []
    for blk in params["blocks"]:
        wq, bq = per_head_cols(blk["wq"], blk["bq"], q_scale)   # scale folded into Q
        wk, bk = per_head_cols(blk["wk"], blk["bk"])
        wv, bv = per_head_cols(blk["wv"], blk["bv"])
        pblocks.append(dict(
            g1=pb(blk["g1"], dpad), be1=pb(blk["be1"], dpad),
            wqkv=jnp.concatenate([wq, wk, wv], axis=1),
            bqkv=jnp.concatenate([bq, bk, bv], axis=1),
            wp=per_head_rows(blk["wp"]), bp=pb(blk["bp"], dpad),
            g2=pb(blk["g2"], dpad), be2=pb(blk["be2"], dpad),
            w1=pw(blk["w1"], dpad, hidpad), b1=pb(blk["b1"], hidpad),
            w2=pw(blk["w2"], hidpad, dpad), b2=pb(blk["b2"], dpad)))
    return dict(blocks=pblocks, gf=pb(params["gf"], dpad), bef=pb(params["bef"], dpad),
                dim=dim, dpad=dpad, ah=ah, ahpad=ahpad,
                hid=hid, hidpad=hidpad, head_count=h)


# ---------------------------------------------------------------------------
# Encoder forward (Pallas) and pure-JAX reference
# ---------------------------------------------------------------------------

def encoder_forward_pallas(x, mask, pp, *, eps=1e-5, tile_m=None,
                           act_dtype=jnp.bfloat16):
    b, s, dim = x.shape
    h = pp["head_count"]
    dpad, ahpad, hidpad = pp["dpad"], pp["ahpad"], pp["hidpad"]
    spad = _round_up(s, 8)

    # bf16 residual stream, zero-padded to lane-dense dims; padded key rows are masked out.
    xf = jnp.pad(x, ((0, 0), (0, spad - s), (0, dpad - dim)))
    xf = xf.reshape(b * spad, dpad).astype(act_dtype)
    mask_p = jnp.pad(mask.astype(jnp.int32),
                     ((0, 0), (0, spad - s), (0, spad - s)))          # int mask, no f32 bias

    for blk in pp["blocks"]:
        # ---- attention sublayer: x = x + P(MHA(LN1(x))) -----------------------------
        qkv = _row_tiled_call(
            functools.partial(_ln_linear_kernel, true_dim=dim, eps=eps),
            [xf], [blk["g1"], blk["be1"], blk["wqkv"], blk["bqkv"]],
            out_cols=3 * h * ahpad, out_dtype=act_dtype, tile_m=tile_m,
            extra_vmem_per_row=dpad * 4)

        attn = _attention_core(qkv, mask_p, batch=b, seq=spad,
                               head_count=h, ahpad=ahpad, out_dtype=act_dtype)

        xf = _row_tiled_call(
            _linear_residual_kernel,
            [attn, xf], [blk["wp"], blk["bp"]],
            out_cols=dpad, out_dtype=act_dtype, tile_m=tile_m,
            extra_vmem_per_row=dpad * 4)

        # ---- FFN sublayer: x = x + W2 GELU(W1 LN2(x) + b1) + b2 ---------------------
        n_rows = xf.shape[0]
        ffn_cost = pl.CostEstimate(
            flops=int(4 * n_rows * dpad * hidpad),
            transcendentals=int(n_rows * hidpad),
            bytes_accessed=int(2 * n_rows * dpad * 2         # x in + out (bf16)
                               + 2 * dpad * hidpad * 2       # w1 + w2 (bf16)
                               + 4 * (hidpad + dpad)))       # biases (f32)
        xf = _row_tiled_call(
            functools.partial(_ln_ffn_residual_kernel, true_dim=dim, eps=eps),
            [xf], [blk["g2"], blk["be2"], blk["w1"], blk["b1"], blk["w2"], blk["b2"]],
            out_cols=dpad, out_dtype=act_dtype, tile_m=tile_m,
            extra_vmem_per_row=(hidpad + dpad) * 4, cost_estimate=ffn_cost)

    y = _row_tiled_call(
        functools.partial(_layernorm_kernel, true_dim=dim, eps=eps),
        [xf], [pp["gf"], pp["bef"]],
        out_cols=dpad, out_dtype=jnp.float32, tile_m=tile_m,
        extra_vmem_per_row=dpad * 4)
    return y.reshape(b, spad, dpad)[:, :s, :dim]


def encoder_forward_reference(x, mask, params, *, eps=1e-5):
    h, ah, dim = params["head_count"], params["ah"], params["dim"]
    b, s, _ = x.shape

    def ln(t, g, be):
        mu = jnp.mean(t, axis=-1, keepdims=True)
        var = jnp.mean((t - mu) ** 2, axis=-1, keepdims=True)
        return (t - mu) / jnp.sqrt(var + eps) * g + be

    out = x
    for blk in params["blocks"]:
        xn = ln(out, blk["g1"], blk["be1"])
        q = xn @ blk["wq"] + blk["bq"]
        k = xn @ blk["wk"] + blk["bk"]
        v = xn @ blk["wv"] + blk["bv"]

        def heads(t):
            return t.reshape(b, s, h, ah).transpose(0, 2, 1, 3)

        qh, kh, vh = heads(q), heads(k), heads(v)
        scores = jnp.einsum("bhqd,bhkd->bhqk", qh, kh) / math.sqrt(ah)
        scores = jnp.where(mask[:, None, :, :] == 0, _MASK_FILL, scores)
        w = jax.nn.softmax(scores, axis=-1)
        att = jnp.einsum("bhqk,bhkd->bhqd", w, vh)
        att = att.transpose(0, 2, 1, 3).reshape(b, s, h * ah)
        out = out + (att @ blk["wp"] + blk["bp"])

        xn2 = ln(out, blk["g2"], blk["be2"])
        ff = jax.nn.gelu(xn2 @ blk["w1"] + blk["b1"], approximate=False)
        out = out + (ff @ blk["w2"] + blk["b2"])
    return ln(out, params["gf"], params["bef"])


if __name__ == "__main__":
    # Small shapes consistent with the module:
    #   dim=32, head_count=2, attention abstraction_coef=2.0 (per-head 64),
    #   FFN abstraction_coef=4.0 (hidden 128), 2 encoder blocks, eps=1e-5.
    batch, seq, dim = 2, 8, 32
    head_count, attn_coef, ffn_coef = 2, 2.0, 4.0
    num_blocks, eps = 2, 1e-5

    key = jax.random.PRNGKey(0)
    kx, kp = jax.random.split(key)
    x = jax.random.normal(kx, (batch, seq, dim), dtype=jnp.float32)
    # attention mask (1 = attend, 0 = masked); mask the last two keys of batch 1
    mask = jnp.ones((batch, seq, seq), dtype=jnp.int32)
    mask = mask.at[1, :, seq - 2:].set(0)

    params = init_encoder_params(kp, num_blocks=num_blocks, dim=dim,
                                 head_count=head_count, attn_coef=attn_coef,
                                 ffn_coef=ffn_coef)
    pparams = pad_encoder_params(params)

    out = encoder_forward_pallas(x, mask, pparams, eps=eps)
    out = jax.block_until_ready(out)

    with jax.default_matmul_precision("highest"):
        ref = encoder_forward_reference(x, mask, params, eps=eps)
    ref = jax.block_until_ready(ref)

    assert out.shape == (batch, seq, dim)
    max_err = float(jnp.max(jnp.abs(out - ref)))
    # bf16 weights/activations vs f32 reference -> looser tolerance than the f32 kernel.
    assert jnp.allclose(out, ref, atol=8e-2, rtol=8e-2), f"mismatch vs reference: {max_err}"
    print("KERNEL_OK")
</pallas_src>

<mosaic_0001>
module attributes {stable_mosaic.version = 11 : i64} {
  func.func @_ln_linear_kernel(%arg0: i32, %arg1: memref<8x128xbf16, #tpu.memory_space<vmem>>, %arg2: memref<1x128xf32, #tpu.memory_space<vmem>>, %arg3: memref<1x128xf32, #tpu.memory_space<vmem>>, %arg4: memref<128x768xbf16, #tpu.memory_space<vmem>>, %arg5: memref<1x768xf32, #tpu.memory_space<vmem>>, %arg6: memref<8x768xbf16, #tpu.memory_space<vmem>>) attributes {dimension_semantics = [#tpu.dimension_semantics<parallel>], iteration_bounds = array<i64: 2>, scalar_prefetch = 0 : i64, scratch_operands = 0 : i64, tpu.core_type = #tpu.core_type<tc>, window_params = [{transform_indices = @transform_0, window_bounds = array<i64: 8, 128>}, {pipeline_mode = #tpu.pipeline_mode<synchronous>, transform_indices = @transform_1, window_bounds = array<i64: 1, 128>}, {pipeline_mode = #tpu.pipeline_mode<synchronous>, transform_indices = @transform_2, window_bounds = array<i64: 1, 128>}, {pipeline_mode = #tpu.pipeline_mode<synchronous>, transform_indices = @transform_3, window_bounds = array<i64: 128, 768>}, {pipeline_mode = #tpu.pipeline_mode<synchronous>, transform_indices = @transform_4, window_bounds = array<i64: 1, 768>}, {transform_indices = @transform_5, window_bounds = array<i64: 8, 768>}]} {
    %c0 = arith.constant 0 : index
    %c0_0 = arith.constant 0 : index
    %0 = vector.load %arg1[%c0, %c0_0] : memref<8x128xbf16, #tpu.memory_space<vmem>>, vector<8x128xbf16>
    %c0_1 = arith.constant 0 : index
    %c0_2 = arith.constant 0 : index
    %1 = vector.load %arg2[%c0_1, %c0_2] : memref<1x128xf32, #tpu.memory_space<vmem>>, vector<1x128xf32>
    %c0_3 = arith.constant 0 : index
    %c0_4 = arith.constant 0 : index
    %2 = vector.load %arg3[%c0_3, %c0_4] : memref<1x128xf32, #tpu.memory_space<vmem>>, vector<1x128xf32>
    %3 = arith.extf %0 : vector<8x128xbf16> to vector<8x128xf32>
    %cst = arith.constant dense<0.000000e+00> : vector<8xf32>
    %4 = vector.multi_reduction <add>, %3, %cst [1] : vector<8x128xf32> to vector<8xf32>
    %5 = vector.shape_cast %4 : vector<8xf32> to vector<8x1xf32>
    %cst_5 = arith.constant 3.125000e-02 : f32
    %6 = vector.broadcast %cst_5 : f32 to vector<8x1xf32>
    %7 = arith.mulf %5, %6 : vector<8x1xf32>
    %8 = vector.broadcast %7 : vector<8x1xf32> to vector<8x128xf32>
    %9 = arith.subf %3, %8 : vector<8x128xf32>
    %10 = arith.mulf %9, %9 : vector<8x128xf32>
    %cst_6 = arith.constant dense<0.000000e+00> : vector<8xf32>
    %11 = vector.multi_reduction <add>, %10, %cst_6 [1] : vector<8x128xf32> to vector<8xf32>
    %12 = vector.shape_cast %11 : vector<8xf32> to vector<8x1xf32>
    %cst_7 = arith.constant 9.600000e+01 : f32
    %13 = vector.broadcast %cst_7 : f32 to vector<8x1xf32>
    %14 = arith.mulf %13, %7 : vector<8x1xf32>
    %15 = arith.mulf %14, %7 : vector<8x1xf32>
    %16 = arith.subf %12, %15 : vector<8x1xf32>
    %cst_8 = arith.constant 3.125000e-02 : f32
    %17 = vector.broadcast %cst_8 : f32 to vector<8x1xf32>
    %18 = arith.mulf %16, %17 : vector<8x1xf32>
    %cst_9 = arith.constant 9.99999974E-6 : f32
    %19 = vector.broadcast %cst_9 : f32 to vector<8x1xf32>
    %20 = arith.addf %18, %19 : vector<8x1xf32>
    %21 = math.rsqrt %20 : vector<8x1xf32>
    %22 = vector.broadcast %21 : vector<8x1xf32> to vector<8x128xf32>
    %23 = arith.mulf %9, %22 : vector<8x128xf32>
    %24 = vector.broadcast %1 : vector<1x128xf32> to vector<8x128xf32>
    %25 = arith.mulf %23, %24 : vector<8x128xf32>
    %26 = vector.broadcast %2 : vector<1x128xf32> to vector<8x128xf32>
    %27 = arith.addf %25, %26 : vector<8x128xf32>
    %28 = arith.truncf %27 : vector<8x128xf32> to vector<8x128xbf16>
    %c0_10 = arith.constant 0 : index
    %c0_11 = arith.constant 0 : index
    %29 = vector.load %arg4[%c0_10, %c0_11] : memref<128x768xbf16, #tpu.memory_space<vmem>>, vector<128x768xbf16>
    %cst_12 = arith.constant dense<0.000000e+00> : vector<8x768xf32>
    %30 = tpu.matmul %28, %29, %cst_12 {dimension_numbers = #tpu.dot_dimension_numbers<[1], [0], [0], [1], [0, 0, 1, 1], [], []>} : vector<8x128xbf16>, vector<128x768xbf16>, vector<8x768xf32> -> vector<8x768xf32>
    %c0_13 = arith.constant 0 : index
    %c0_14 = arith.constant 0 : index
    %31 = vector.load %arg5[%c0_13, %c0_14] : memref<1x768xf32, #tpu.memory_space<vmem>>, vector<1x768xf32>
    %32 = vector.broadcast %31 : vector<1x768xf32> to vector<8x768xf32>
    %33 = arith.addf %30, %32 : vector<8x768xf32>
    %34 = arith.truncf %33 : vector<8x768xf32> to vector<8x768xbf16>
    %c0_15 = arith.constant 0 : index
    %c0_16 = arith.constant 0 : index
    %35 = vector.load %arg6[%c0_15, %c0_16] : memref<8x768xbf16, #tpu.memory_space<vmem>>, vector<8x768xbf16>
    tpu.vector_store %arg6[%c0_15, %c0_16], %34 {strides = array<i32>} : memref<8x768xbf16, #tpu.memory_space<vmem>>, vector<8x768xbf16>,
    return
  }
  func.func @transform_0(%arg0: i32) -> (i32, i32) {
    %c0_i32 = arith.constant 0 : i32
    %c0_i32_0 = arith.constant 0 : i32
    return %arg0, %c0_i32 : i32, i32
  }
  func.func @transform_1(%arg0: i32) -> (i32, i32) {
    %c0_i32 = arith.constant 0 : i32
    %c0_i32_0 = arith.constant 0 : i32
    %c0_i32_1 = arith.constant 0 : i32
    return %c0_i32, %c0_i32_0 : i32, i32
  }
  func.func @transform_2(%arg0: i32) -> (i32, i32) {
    %c0_i32 = arith.constant 0 : i32
    %c0_i32_0 = arith.constant 0 : i32
    %c0_i32_1 = arith.constant 0 : i32
    return %c0_i32, %c0_i32_0 : i32, i32
  }
  func.func @transform_3(%arg0: i32) -> (i32, i32) {
    %c0_i32 = arith.constant 0 : i32
    %c0_i32_0 = arith.constant 0 : i32
    %c0_i32_1 = arith.constant 0 : i32
    return %c0_i32, %c0_i32_0 : i32, i32
  }
  func.func @transform_4(%arg0: i32) -> (i32, i32) {
    %c0_i32 = arith.constant 0 : i32
    %c0_i32_0 = arith.constant 0 : i32
    %c0_i32_1 = arith.constant 0 : i32
    return %c0_i32, %c0_i32_0 : i32, i32
  }
  func.func @transform_5(%arg0: i32) -> (i32, i32) {
    %c0_i32 = arith.constant 0 : i32
    %c0_i32_0 = arith.constant 0 : i32
    return %arg0, %c0_i32 : i32, i32
  }
}

</mosaic_0001>

<bundles_post_ra>
// kernel: tpu_custom_call.1
= control target key start
LH: loop header
LB: loop body
LE: loop exit
PB: predicated region body
PF: predicated region fallthrough
CT: control target
= control target key end

     0   :  { %10 = vsyncpa [#allocation3], 0  ;;  %s1435_s0 = inlined_call_operand.hbm [shape: bf16[16,128], index: 0, kind: input, shape index: {}]   ;;  %s1436_s1 = inlined_call_operand.vmem [shape: f32[1,128], index: 1, kind: input, shape index: {}]   ;;  %s1437_s2 = inlined_call_operand.vmem [shape: f32[1,128], index: 2, kind: input, shape index: {}]   ;;  %s1438_s3 = inlined_call_operand.hbm [shape: bf16[128,768], index: 3, kind: input, shape index: {}]   ;;  %s1439_s4 = inlined_call_operand.vmem [shape: f32[1,768], index: 4, kind: input, shape index: {}]   ;;  %s1440_s5 = inlined_call_operand.hbm [shape: bf16[16,768], index: 5, kind: output, shape index: {}]  }
   0x1   :  { %12 = vsyncpa [#allocation3 + $0x1], 0 }
   0x2   :  { %13 = vsyncpa [#allocation6], 0 }
   0x3   :  { %14 = vsyncpa [#allocation4], 0 }
   0x4   :  { %16 = vsyncpa [#allocation4 + $0x1], 0  ;;  %s1224_s18 = smov 0   ;;  %s1226_s19 = smov 0  }
   0x5   :  { %s1228_s20 = smov 0   ;;  %s1230_s21 = smov 0  }
   0x6 LB: > { %s1245_s22 = sadd.s32 4294967295, %s1186_s21   ;;  %s854_s23 = sadd.s32 4294967294, %s1186_s21   ;;  %s1186_s21 = sphi %s1230_s21, %s1460_s21   ;;  %s1182_s20 = sphi %s1228_s20, %s1459_s20   ;;  %s1178_s19 = sphi %s1226_s19, %s1458_s19   ;;  %s1174_s18 = sphi %s1224_s18, %s1457_s18  }
   0x7   : > { %p42_p0 = scmp.ne.s32.totalorder %s1178_s19, %s1174_s18  ;;  %p1441_p1 = scmp.eq.s32.totalorder %s1245_s22, 0 }
   0x8   : > { %p156_p3 = scmp.eq.s32.totalorder %s854_s23, 1  ;;  %p855_p5 = scmp.ge.s32.totalorder %s1186_s21, 1 }
   0x9   : > { %p1254_p4 = por %p1441_p1, %p42_p0  ;;  %p163_p7 = scmp.lt.s32.totalorder %s1186_s21, 3 }
   0xa   : > { %p1259_p6 = por %p156_p3, %p42_p0  ;;  %s1188_s27 = smov [#allocation5]  }
   0xb   : > { %s1444_s24 = scalar_select %p1254_p4, 1, 0 }
   0xc   : > { %s1445_s25 = scalar_select %p1259_p6, 1, 0 }
   0xd   : > { %p1264_p8 = pnand %p855_p5, %p163_p7  ;;  %s181_s28 = sshll.u32 %s1188_s27, 4  ;;  %s1268_s28 = int_to_ptr.vmem [resolvable:$true] %s181_s28 }
   0xe   : > { %s1280_s30 = sadd.s32 1, %s1186_s21   ;;  %s29_s6 = sadd.s32 1, %s1182_s20 }
   0xf   : > { %s1446_s26 = scalar_select %p1264_p8, 1, 0 }
  0x10   : > { %p932_p9 = pneg %p1264_p8  ;;  %s26_s7 = ssub.s32 %s1186_s21, %s1280_s30 }
  0x11   : > { %s1058_s10 = scalar_lea.hbm %s1438_s3, 6144 }
  0x12   : > { %p1275_p11 = pnand %p932_p9, %p1441_p1  ;;  %p1059_p12 = scmp.ne.s32.totalorder %s1438_s3, %s1058_s10 }
  0x13   : > { %p1065_p5 = scmp.lt.u32.totalorder %s1058_s10, %s1438_s3 }
  0x14   : > { %p1060_p13 = pneg %p1275_p11 }
  0x16   : > { %p1061_p0 = pnand %p1060_p13, %p1059_p12 }
  0x18   : > { %p1062_p3 = pneg %p1061_p0 }
  0x1a   : > { %p1067_p7 = pnand %p1065_p5, %p1062_p3 }
  0x1c   : > { %1070 = shalt.err (!%p1067_p7)
}
  0x1d   : > { %s1071_s15 = scalar_lea.vmem %s1268_s28, 6144  ;;  %p1079_p2 = scmp.lt.s32.totalorder %s1268_s28, %s1268_s28 }
  0x1e   : > { %p1072_p9 = scmp.ne.s32.totalorder %s1268_s28, %s1071_s15  ;;  %p1080_p6 = scmp.lt.s32.totalorder %s1071_s15, %s1071_s15 }
  0x20   : > { %p1074_p10 = pnand %p1072_p9, %p1060_p13  ;;  %p1081_p4 = por %p1080_p6, %p1079_p2 }
  0x22   : > { %p1075_p1 = pneg %p1074_p10 }
  0x24   : > { %p1082_p8 = pnand %p1081_p4, %p1075_p1 }
  0x26   : > { %1085 = shalt.err (!%p1082_p8)
}
  0x27   : > { %s1189_s16 = smov 384   ;;  %s1190_s17 = smov 24  }
  0x28   : > { %935 = dma.hbm_to_vmem [thread:$0]  (!%p1275_p11), %s1438_s3, 6144, %s1268_s28, [#allocation6], %s1189_s16, %s1189_s16, %s1190_s17  }
  0x29   : > { %p27_p2 = scmp.eq.s32.totalorder %s26_s7, 0  ;;  %p36_p1 = scmp.ne.s32.totalorder %s1182_s20, %s1178_s19 }
  0x2a   : > { %p37_p4 = scmp.eq.s32.totalorder %s1186_s21, 0  ;;  %p945_p6 = scmp.lt.s32.totalorder %s1186_s21, 2 }
  0x2b   : > { %s1311_s8 = scalar_select %p27_p2, %s1182_s20, %s29_s6  }
  0x2c   : > { %p38_p8 = por %p37_p4, %p36_p1  ;;  %p1448_p10 = scmp.eq.s32.totalorder %s1245_s22, 1 }
  0x2d   : > { %s198_s10 = sand.u32 1, %s1182_s20   ;;  %s859_s11 = sshll.u32 %s1186_s21, 6 }
  0x2e   : > { %p1315_p12 = por %p1448_p10, %p36_p1  ;;  %s858_s12 = sshll.u32 %s198_s10, 2 }
  0x2f   : > { %s1324_s14 = scalar_lea.hbm %s1435_s0, %s859_s11  ;;  %s202_s28 = scalar_lea.vmem [#allocation2], %s858_s12 }
  0x30   : > { %s209_s6 = sshll.u32 %s202_s28, 4  ;;  %p1326_p11 = pnand %p945_p6, %p38_p8  ;;  %s1330_s6 = int_to_ptr.vmem [resolvable:$true] %s209_s6 }
  0x31   : > { %s199_s15 = scalar_lea.sflag [#allocation3], %s198_s10  ;;  %s1086_s16 = scalar_lea.hbm %s1324_s14, 64 }
  0x32   : > { %p1087_p13 = scmp.ne.s32.totalorder %s1324_s14, %s1086_s16  ;;  %p1088_p0 = pneg %p1326_p11 }
  0x33   : > { %s1091_s27 = scalar_lea.hbm %s1435_s0, 128  ;;  %p1092_p7 = scmp.lt.u32.totalorder %s1324_s14, %s1435_s0 }
  0x34   : > { %p1089_p3 = pnand %p1088_p0, %p1087_p13  ;;  %p1093_p9 = scmp.lt.u32.totalorder %s1091_s27, %s1086_s16 }
  0x35   : > { %p1095_p1 = scmp.lt.u32.totalorder %s1086_s16, %s1324_s14 }
  0x36   : > { %p1090_p5 = pneg %p1089_p3  ;;  %p1094_p2 = por %p1093_p9, %p1092_p7 }
  0x38   : > { %p1096_p4 = por %p1095_p1, %p1094_p2 }
  0x3a   : > { %p1097_p6 = pnand %p1096_p4, %p1090_p5 }
  0x3c   : > { %1100 = shalt.err (!%p1097_p6)
}
  0x3d   : > { %s1101_s10 = scalar_lea.vmem %s1330_s6, 64  ;;  %s1191_s29 = smov [#allocation2]  }
  0x3e   : > { %p1102_p8 = scmp.ne.s32.totalorder %s1330_s6, %s1101_s10  ;;  %s1106_s13 = sshll.u32 %s1191_s29, 4  ;;  %s1107_s13 = int_to_ptr.vmem [resolvable:$false] %s1106_s13 }
  0x3f   : > { %s1108_s28 = scalar_lea.vmem %s1107_s13, 128  ;;  %p1109_p3 = scmp.lt.s32.totalorder %s1330_s6, %s1107_s13 }
  0x40   : > { %p1104_p10 = pnand %p1102_p8, %p1088_p0  ;;  %p1110_p7 = scmp.lt.s32.totalorder %s1108_s28, %s1101_s10 }
  0x42   : > { %p1105_p13 = pneg %p1104_p10  ;;  %p1111_p9 = por %p1110_p7, %p1109_p3 }
  0x44   : > { %p1112_p2 = pnand %p1111_p9, %p1105_p13 }
  0x46   : > { %1115 = shalt.err (!%p1112_p2)
}
  0x47   : > { %939 = dma.hbm_to_vmem [thread:$0]  (!%p1326_p11), %s1324_s14, 64, %s1330_s6, %s199_s15  }
  0x48   : > { %p1451_p5 = scmp.ne.s32.totalorder %s1446_s26, 0 }
  0x49   : > { %s1360_s16 = sand.u32 (!%p1451_p5), 1, %s1178_s19   ;;  %p1452_p0 = scmp.ne.s32.totalorder (!%p1451_p5), %s1444_s24, 0 }
  0x4a   : > { %218 = sbr.rel (%p1451_p5) target bundleno = 666 (0x29a), region = 40  ;;  %s861_s17 = sshll.u32 (!%p1451_p5), %s1360_s16, 2 }
  0x4b   : > { %s221_s23 = scalar_lea.sflag (!%p1451_p5), [#allocation3], %s1360_s16  ;;  %s224_s27 = scalar_lea.vmem (!%p1451_p5), [#allocation2], %s861_s17 }
  0x51   : > { %1161 = dma.done.wait (%p1452_p0), %s221_s23, 64  }
  0x52   : > { %1163 = vsyncadd (%p1452_p0), %s221_s23, 4294967232  ;;  %p1453_p1 = scmp.eq.s32.totalorder %s1245_s22, 0 }
  0x54   : > { %1165 = dma.done.wait (%p1453_p1), [#allocation6], 6144   ;;  %p1454_p11 = pmov %p1453_p1 }
  0x55   : > { %v256_v0 = vld [vmem:[%s224_s27] sm:$0xf]  ;;  %v987_v4 = vld [vmem:[#allocation5 + $0xc] ss:$24 sps:$4 sm:$0xff]   ;;  %v989_v5 = vld [vmem:[#allocation5 + $0x8] ss:$24 sps:$4 sm:$0xff]  }
  0x56   : > { %1167 = vsyncadd (%p1454_p11), [#allocation6], 4294961152  ;;  %v259_v1 = vunpack.c.l.bf16 %v256_v0  ;;  %v984_v2 = vld [vmem:[#allocation5 + $0x4] ss:$24 sps:$4 sm:$0xff]   ;;  %v986_v3 = vld [vmem:[#allocation5] ss:$24 sps:$4 sm:$0xff]   ;;  %650 = vmatprep.subr.bf16.mxu1 %v987_v4  ;;  %v339_v4 = vlaneseq }
  0x57   : > { %v990_v6 = vld [vmem:[#allocation5 + $0x34] ss:$24 sps:$4 sm:$0xff]   ;;  %609 = vmatprep.subr.bf16.mxu0 %v984_v2  ;;  %651 = vmatpush1.bf16.msra.mxu1 %v989_v5  ;;  %v992_v8 = vld [vmem:[#allocation5 + $0x30] ss:$24 sps:$4 sm:$0xff]   ;;  %v996_v14 = vld [vmem:[#allocation5 + $0x64] ss:$24 sps:$4 sm:$0xff]  }
  0x58   : > { %260 = vadd.xlane.f32.xlu0 %v259_v1  ;;  %v993_v7 = vld [vmem:[#allocation5 + $0x3c] ss:$24 sps:$4 sm:$0xff]   ;;  %610 = vmatpush1.bf16.msra.mxu0 %v986_v3  ;;  %v995_v9 = vld [vmem:[#allocation5 + $0x38] ss:$24 sps:$4 sm:$0xff]   ;;  %v999_v16 = vld [vmem:[#allocation5 + $0x6c] ss:$24 sps:$4 sm:$0xff]  }
  0x59   : > { %611 = vmatprep.subr.bf16.mxu0 %v990_v6  ;;  %652 = vmatprep.subr.bf16.mxu1 %v993_v7  ;;  %v998_v15 = vld [vmem:[#allocation5 + $0x60] ss:$24 sps:$4 sm:$0xff]   ;;  %v1002_v18 = vld [vmem:[#allocation5 + $0x94] ss:$24 sps:$4 sm:$0xff]   ;;  %v1004_v19 = vld [vmem:[#allocation5 + $0x90] ss:$24 sps:$4 sm:$0xff]  }
  0x5a   : > { %v1001_v17 = vld [vmem:[#allocation5 + $0x68] ss:$24 sps:$4 sm:$0xff]   ;;  %v1005_v20 = vld [vmem:[#allocation5 + $0x9c] ss:$24 sps:$4 sm:$0xff]   ;;  %v1007_v21 = vld [vmem:[#allocation5 + $0x98] ss:$24 sps:$4 sm:$0xff]  }
  0x5b   : > { %653 = vmatpush1.bf16.msra.mxu1 %v995_v9  ;;  %v1008_v22 = vld [vmem:[#allocation5 + $0xc4] ss:$24 sps:$4 sm:$0xff]   ;;  %v1010_v23 = vld [vmem:[#allocation5 + $0xc0] ss:$24 sps:$4 sm:$0xff]   ;;  %v1014_v26 = vld [vmem:[#allocation5 + $0xf4] ss:$24 sps:$4 sm:$0xff]  }
  0x5c   : > { %612 = vmatpush1.bf16.msra.mxu0 %v992_v8  ;;  %654 = vmatprep.subr.bf16.mxu1 %v999_v16  ;;  %v1011_v24 = vld [vmem:[#allocation5 + $0xcc] ss:$24 sps:$4 sm:$0xff]   ;;  %v1013_v25 = vld [vmem:[#allocation5 + $0xc8] ss:$24 sps:$4 sm:$0xff]   ;;  %v1017_v27 = vld [vmem:[#allocation5 + $0xfc] ss:$24 sps:$4 sm:$0xff]  }
  0x5d   : > { %613 = vmatprep.subr.bf16.mxu0 %v996_v14  ;;  %v1016_v28 = vld [vmem:[#allocation5 + $0xf0] ss:$24 sps:$4 sm:$0xff]   ;;  %v1020_v30 = vld [vmem:[#allocation5 + $0x124] ss:$24 sps:$4 sm:$0xff]   ;;  %v1192_v32 = vmov 0   ;;  %v340_v5 = vshrl.u32 %v339_v4, 7 }
  0x5e   : > { %v1019_v29 = vld [vmem:[#allocation5 + $0xf8] ss:$24 sps:$4 sm:$0xff]   ;;  %v1023_v31 = vld [vmem:[#allocation5 + $0x12c] ss:$24 sps:$4 sm:$0xff]   ;;  %641 = vmatprep.mubr.bf16.mxu0 %v1192_v32  ;;  %682 = vmatprep.mubr.bf16.mxu1 %v1192_v32  ;;  %v1025_v34 = vld [vmem:[#allocation5 + $0x128] ss:$24 sps:$4 sm:$0xff]  }
  0x5f   : > { %655 = vmatpush1.bf16.msra.mxu1 %v1001_v17  ;;  %v1022_v33 = vld [vmem:[#allocation5 + $0x120] ss:$24 sps:$4 sm:$0xff]   ;;  %v1026_v35 = vld [vmem:[#allocation5 + $0x154] ss:$24 sps:$4 sm:$0xff]   ;;  %v1028_v37 = vld [vmem:[#allocation5 + $0x150] ss:$24 sps:$4 sm:$0xff]  }
  0x60   : > { %614 = vmatpush1.bf16.msra.mxu0 %v998_v15  ;;  %656 = vmatprep.subr.bf16.mxu1 %v1005_v20  ;;  %v1029_v36 = vld [vmem:[#allocation5 + $0x15c] ss:$24 sps:$4 sm:$0xff]   ;;  %v1031_v38 = vld [vmem:[#allocation5 + $0x158] ss:$24 sps:$4 sm:$0xff]   ;;  %v341_v6 = vsub.s32 0, %v340_v5  ;;  %v349_v7 = vsub.s32 2, %v340_v5 }
  0x61   : > { %615 = vmatprep.subr.bf16.mxu0 %v1002_v18  ;;  %v1034_v39 = vld [vmem:[#allocation5 + $0x14] ss:$24 sps:$4 sm:$0xff]   ;;  %v863_v47 = vld [vmem:[%s1436_s1] ss:$0 sm:$0xff]  ;;  %v1032_v52 = vld [vmem:[#allocation5 + $0x10] ss:$24 sps:$4 sm:$0xff]  }
  0x62   : > { %v864_v49 = vld [vmem:[%s1437_s2] ss:$0 sm:$0xff]  ;;  %v1037_v54 = vld [vmem:[#allocation5 + $0x44] ss:$24 sps:$4 sm:$0xff]   ;;  %v1040_v56 = vld [vmem:[#allocation5 + $0x74] ss:$24 sps:$4 sm:$0xff]  }
  0x63   : > { %657 = vmatpush1.bf16.msra.mxu1 %v1007_v21  ;;  %v1035_v55 = vld [vmem:[#allocation5 + $0x40] ss:$24 sps:$4 sm:$0xff]   ;;  %v1038_v57 = vld [vmem:[#allocation5 + $0x70] ss:$24 sps:$4 sm:$0xff]   ;;  %v1043_v58 = vld [vmem:[#allocation5 + $0xa4] ss:$24 sps:$4 sm:$0xff]  }
  0x64   : > { %616 = vmatpush1.bf16.msra.mxu0 %v1004_v19  ;;  %658 = vmatprep.subr.bf16.mxu1 %v1011_v24  ;;  %v1041_v59 = vld [vmem:[#allocation5 + $0xa0] ss:$24 sps:$4 sm:$0xff]   ;;  %v1046_v60 = vld [vmem:[#allocation5 + $0xd4] ss:$24 sps:$4 sm:$0xff]   ;;  %v1044_v61 = vld [vmem:[#allocation5 + $0xd0] ss:$24 sps:$4 sm:$0xff]  }
  0x65   : > { %617 = vmatprep.subr.bf16.mxu0 %v1008_v22  ;;  %v1049_v62 = vld [vmem:[#allocation5 + $0x104] ss:$24 sps:$4 sm:$0xff]   ;;  %v1047_v63 = vld [vmem:[#allocation5 + $0x100] ss:$24 sps:$4 sm:$0xff]   ;;  %v1052_v0 = vld [vmem:[#allocation5 + $0x134] ss:$24 sps:$4 sm:$0xff]  }
  0x66   : > { %v1055_v2 = vld [vmem:[#allocation5 + $0x164] ss:$24 sps:$4 sm:$0xff]   ;;  %v1053_v3 = vld [vmem:[#allocation5 + $0x160] ss:$24 sps:$4 sm:$0xff]   ;;  %v345_v9 = vsub.s32 1, %v340_v5  ;;  %s922_s11 = smul.u32 24, %s1360_s16 }
  0x67   : > { %659 = vmatpush1.bf16.msra.mxu1 %v1013_v25  ;;  %v337_v8 = vld [vmem:[%s1439_s4] sm:$0x3f]  ;;  %s923_s10 = smul.u32 384, %s1245_s22  ;;  %s760_s23 = scalar_lea.sflag [#allocation4], %s1360_s16 }
  0x68   : > { %618 = vmatpush1.bf16.msra.mxu0 %v1010_v23  ;;  %660 = vmatprep.subr.bf16.mxu1 %v1017_v27  ;;  %s254_s12 = scalar_lea.vmem [#allocation7], %s922_s11  ;;  %s1193_s27 = smov [#allocation7]  }
  0x69   : > { %619 = vmatprep.subr.bf16.mxu0 %v1014_v26  ;;  %s774_s29 = sshll.u32 %s254_s12, 4  ;;  %s1391_s17 = scalar_lea.hbm %s1440_s5, %s923_s10  ;;  %s1393_s29 = int_to_ptr.vmem [resolvable:$true] %s774_s29 }
  0x6a   : > { %s1116_s22 = scalar_lea.vmem %s1393_s29, 384  ;;  %s1120_s24 = sshll.u32 %s1193_s27, 4  ;;  %s1121_s24 = int_to_ptr.vmem [resolvable:$false] %s1120_s24 }
  0x6b   : > { %661 = vmatpush1.bf16.msra.mxu1 %v1019_v29  ;;  %v357_v29 = vsub.s32 4, %v340_v5  ;;  %p1117_p4 = scmp.ne.s32.totalorder %s1393_s29, %s1116_s22  ;;  %s1122_s26 = scalar_lea.vmem %s1121_s24, 768 }
  0x6c   : > { %620 = vmatpush1.bf16.msra.mxu0 %v1016_v28  ;;  %662 = vmatprep.subr.bf16.mxu1 %v1023_v31  ;;  %p1123_p10 = scmp.lt.s32.totalorder %s1393_s29, %s1121_s24  ;;  %p1124_p13 = scmp.lt.s32.totalorder %s1122_s26, %s1116_s22 }
  0x6d   : > { %621 = vmatprep.subr.bf16.mxu0 %v1020_v30  ;;  %v361_v30 = vsub.s32 5, %v340_v5  ;;  %v358_v31 = vrot.slane %v337_v8, %v357_v29  ;;  %p1118_p6 = pnand %p1117_p4, %p1315_p12 }
  0x6e   : > { %p1125_p3 = por %p1124_p13, %p1123_p10 }
  0x6f   : > { %663 = vmatpush1.bf16.msra.mxu1 %v1025_v34  ;;  %p1119_p8 = pneg %p1118_p6 }
  0x70   : > { %622 = vmatpush1.bf16.msra.mxu0 %v1022_v33  ;;  %664 = vmatprep.subr.bf16.mxu1 %v1029_v36 }
  0x71   : > { %623 = vmatprep.subr.bf16.mxu0 %v1026_v35  ;;  %p1126_p7 = pnand %p1125_p3, %p1119_p8 }
  0x73   : > { %665 = vmatpush1.bf16.msra.mxu1 %v1031_v38 }
  0x74   : > { %624 = vmatpush1.bf16.msra.mxu0 %v1028_v37 }
  0x75   : > { %691 = vmatprep.subr.bf16.mxu0 %v1034_v39 }
  0xe5   : > { %v261_v10 = vpop.xlane.xlu0 %260 }
  0xe6   : > { %v262_v11 = vmul.f32 0.03125, %v261_v10  ;;  %v353_v10 = vsub.s32 3, %v340_v5 }
  0xe8   : > { %v1372_v12 = vsub.f32 %v259_v1, %v262_v11  ;;  %v267_v40 = vmul.f32 96.0, %v262_v11  ;;  %v1050_v1 = vld [vmem:[#allocation5 + $0x130] ss:$24 sps:$4 sm:$0xff]   ;;  %v354_v14 = vrot.slane %v337_v8, %v353_v10 }
  0xea   : > { %v264_v13 = vmul.f32 %v1372_v12, %v1372_v12  ;;  %v268_v41 = vmul.f32 %v267_v40, %v262_v11  ;;  %v342_v11 = vrot.slane %v337_v8, %v341_v6 }
  0xec   : > { %265 = vadd.xlane.f32.xlu0 %v264_v13  ;;  %v346_v13 = vrot.slane %v337_v8, %v345_v9 }
 0x179   : > { %v266_v42 = vpop.xlane.xlu0 %265 }
 0x17a   : > { %v269_v43 = vsub.f32 %v266_v42, %v268_v41 }
 0x17c   : > { %v270_v44 = vmul.f32 0.03125, %v269_v43 }
 0x17e   : > { %v271_v45 = vadd.f32 1e-05, %v270_v44 }
 0x180   : > { %1056 = vrsqrt.f32 %v271_v45 }
 0x18a   : > { %v1057_v46 = vpop.eup %1056 }
 0x18b   : > { %v273_v48 = vmul.f32 %v1057_v46, %v1372_v12  ;;  %v350_v12 = vrot.slane %v337_v8, %v349_v7 }
 0x18d   : > { %v280_v50 = vmul.f32 %v863_v47, %v273_v48 }
 0x18f   : > { %v287_v51 = vadd.f32 %v864_v49, %v280_v50 }
 0x191   : > { %v288_v53 = vpack.c.bf16 %v287_v51, %v287_v51 }
 0x193   : > { %642 = vmatmul.mubr.bf16.vlgmr.msra.gmra.mrb[0].mxu0 %v288_v53  ;;  %683 = vmatmul.mubr.bf16.vlgmr.msra.gmra.mrb[0].mxu1 %v288_v53 }
 0x194   : > { %692 = vmatpush1.bf16.msra.mxu0 %v1032_v52  ;;  %723 = vmatprep.mubr.bf16.mxu0 %v1192_v32  ;;  %v362_v32 = vrot.slane %v337_v8, %v361_v30 }
 0x195   : > { %693 = vmatprep.subr.bf16.mxu0 %v1037_v54 }
 0x198   : > { %694 = vmatpush1.bf16.msra.mxu0 %v1035_v55 }
 0x199   : > { %695 = vmatprep.subr.bf16.mxu0 %v1040_v56 }
 0x19c   : > { %696 = vmatpush1.bf16.msra.mxu0 %v1038_v57 }
 0x19d   : > { %697 = vmatprep.subr.bf16.mxu0 %v1043_v58 }
 0x1a0   : > { %698 = vmatpush1.bf16.msra.mxu0 %v1041_v59 }
 0x1a1   : > { %699 = vmatprep.subr.bf16.mxu0 %v1046_v60 }
 0x1a4   : > { %700 = vmatpush1.bf16.msra.mxu0 %v1044_v61 }
 0x1a5   : > { %701 = vmatprep.subr.bf16.mxu0 %v1049_v62 }
 0x1a8   : > { %702 = vmatpush1.bf16.msra.mxu0 %v1047_v63 }
 0x1a9   : > { %703 = vmatprep.subr.bf16.mxu0 %v1052_v0 }
 0x1ac   : > { %704 = vmatpush1.bf16.msra.mxu0 %v1050_v1 }
 0x1ad   : > { %705 = vmatprep.subr.bf16.mxu0 %v1055_v2 }
 0x1b0   : > { %706 = vmatpush1.bf16.msra.mxu0 %v1053_v3 }
 0x1b3   : > { %724 = vmatmul.mubr.bf16.vlgmr.msra.gmra.mrb[4].mxu0 %v288_v53 }
 0x266   : > { %v643_v15 = vpop.f32.mrb[0].mxu0  ;;  %v684_v16 = vpop.f32.mrb[0].mxu1 }
 0x267   : > { %v644_v17 = vadd.f32 %v643_v15, %v342_v11  ;;  %v685_v18 = vadd.f32 %v684_v16, %v350_v12  ;;  %v645_v19 = vpop.f32.mrb[1].mxu0  ;;  %v686_v20 = vpop.f32.mrb[1].mxu1 }
 0x268   : > { %v646_v21 = vadd.f32 %v645_v19, %v346_v13  ;;  %v687_v22 = vadd.f32 %v686_v20, %v354_v14  ;;  %v647_v23 = vpop.f32.mrb[2].mxu0  ;;  %v688_v24 = vpop.f32.mrb[2].mxu1 }
 0x269   : > { %v648_v25 = vpop.f32.mrb[3].mxu0  ;;  %v689_v26 = vpop.f32.mrb[3].mxu1 }
 0x26a   : > { %v919_v27 = vpack.c.bf16 %v646_v21, %v644_v17  ;;  %v920_v28 = vpack.c.bf16 %v687_v22, %v685_v18 }
 0x26c   : > { %756 = vst [vmem:[%s254_s12] sm:$0xff] %v919_v27  ;;  %757 = vst [vmem:[%s254_s12 + $0x8] sm:$0xff] %v920_v28 }
 0x286   : > { %v725_v33 = vpop.f32.mrb[4].mxu0 }
 0x287   : > { %v726_v34 = vadd.f32 %v725_v33, %v358_v31  ;;  %v727_v35 = vpop.f32.mrb[5].mxu0 }
 0x288   : > { %v728_v36 = vadd.f32 %v727_v35, %v362_v32  ;;  %v729_v37 = vpop.f32.mrb[6].mxu0 }
 0x289   : > { %v730_v38 = vpop.f32.mrb[7].mxu0 }
 0x28a   : > { %v921_v39 = vpack.c.bf16 %v728_v36, %v726_v34 }
 0x28c   : > { %758 = vst [vmem:[%s254_s12 + $0x10] sm:$0xff] %v921_v39 }
 0x28d   : > { %1129 = shalt.err (!%p1126_p7)
}
 0x28e   : > { %s1130_s16 = scalar_lea.hbm %s1391_s17, 384  ;;  %s1134_s7 = scalar_lea.hbm %s1440_s5, 768 }
 0x28f   : > { %p1131_p9 = scmp.ne.s32.totalorder %s1391_s17, %s1130_s16  ;;  %p1135_p0 = scmp.lt.u32.totalorder %s1391_s17, %s1440_s5 }
 0x290   : > { %p1136_p1 = scmp.lt.u32.totalorder %s1134_s7, %s1130_s16  ;;  %p1138_p4 = scmp.lt.u32.totalorder %s1130_s16, %s1391_s17 }
 0x291   : > { %p1132_p2 = pnand %p1131_p9, %p1315_p12 }
 0x292   : > { %p1137_p11 = por %p1136_p1, %p1135_p0 }
 0x293   : > { %p1133_p5 = pneg %p1132_p2 }
 0x294   : > { %p1139_p6 = por %p1138_p4, %p1137_p11 }
 0x296   : > { %p1140_p8 = pnand %p1139_p6, %p1133_p5 }
 0x298   : > { %1143 = shalt.err (!%p1140_p8)
}
 0x299   : > { %930 = dma.vmem_to_hbm [thread:$0]  (%p1315_p12), %s1393_s29, 384, %s1391_s17, %s760_s23  }
 0x29a PF: > { %s786_s12 = sand.u32 1, %s1174_s18   ;;  %p1455_p10 = scmp.ne.s32.totalorder %s1445_s25, 0 }
 0x29b   : > { %p1456_p13 = scmp.ge.s32.totalorder %s1186_s21, 2  ;;  %s787_s10 = scalar_lea.sflag [#allocation4], %s786_s12 }
 0x29d   : > { %p941_p3 = pnand %p1456_p13, %p1455_p10 }
 0x29f   : > { %1169 = dma.done.wait (!%p941_p3), %s787_s10, 384  }
 0x2a0   : > { %1171 = vsyncadd (!%p941_p3), %s787_s10, 4294966912  ;;  %p19_p7 = scmp.ge.s32.totalorder %s1280_s30, 4   ;;  %s1457_s18 = smov %s1178_s19 }
 0x2a1   : > { %s1458_s19 = smov %s1182_s20  ;;  %s1459_s20 = smov %s1311_s8 }
 0x2a2   : > { %s1460_s21 = smov %s1280_s30  ;;  %21 = sbr.rel (!%p19_p7) target bundleno = 6 (0x6), region = 89 }
 0x2a9   :  { %792 = vsyncpa [#allocation3], 1 }
 0x2aa   :  { %794 = vsyncpa [#allocation3 + $0x1], 1 }
 0x2ab   :  { %795 = vsyncpa [#allocation6], 1 }
 0x2ac   :  { %796 = vsyncpa [#allocation4], 1 }
 0x2ad   :  { %798 = vsyncpa [#allocation4 + $0x1], 1 }

</bundles_post_ra>
